<compile_context>
chip_gen: v7x
topology: tpu7x:2x2x1
jax: 0.10.0
libtpu: 0.0.40
codegen_flags: <defaults>
</compile_context>

<pallas_src>
import jax
import jax.numpy as jnp
from jax.experimental import pallas as pl
from jax.experimental.pallas import tpu as pltpu  # noqa: F401  (kept for TPU-specific tuning hooks)

EMBED_DIM = 32
NUM_HEADS = 4
EXPANSION = 4
SEQ = 8
BATCH = 2
HEAD_DIM = EMBED_DIM // NUM_HEADS
HIDDEN = EXPANSION * EMBED_DIM
LN_EPS = 1e-5
ROWS = BATCH * SEQ


def _layernorm(y, gamma, beta):
    mu = jnp.mean(y, axis=-1, keepdims=True)
    var = jnp.mean((y - mu) ** 2, axis=-1, keepdims=True)
    return (y - mu) * jax.lax.rsqrt(var + LN_EPS) * gamma + beta


def encoder_block_kernel(x_ref, mask_ref, w_in_ref, b_in_ref, w_out_ref, b_out_ref,
                         g1_ref, bt1_ref, w1_ref, b1_ref, w2_ref, b2_ref,
                         g2_ref, bt2_ref, o_ref):
    E, H, Dh = EMBED_DIM, NUM_HEADS, HEAD_DIM
    x = x_ref[...]                                       # (B*S, E) — batch folded into rows

    # --- QKV projection (weights pre-transposed, Q-scale pre-folded) ---
    qkv = jnp.dot(x, w_in_ref[...],
                  preferred_element_type=jnp.float32) + b_in_ref[...]   # (B*S, 3E)
    q = qkv[:, :E]
    k = qkv[:, E:2 * E]
    v = qkv[:, 2 * E:]

    mask = mask_ref[...]                                 # (B*S, B*S) additive block-diag mask

    # --- Multi-head attention: accumulate each head straight into out-proj ---
    attn = jnp.zeros((ROWS, E), jnp.float32)
    for h in range(H):                                   # H=4 static, fully unrolled
        qh = q[:, h * Dh:(h + 1) * Dh]                   # (B*S, Dh)
        kh = k[:, h * Dh:(h + 1) * Dh]
        vh = v[:, h * Dh:(h + 1) * Dh]
        # scores = qh @ kh^T without an explicit transpose (contract last dims)
        s = jax.lax.dot_general(qh, kh, (((1,), (1,)), ((), ())),
                                preferred_element_type=jnp.float32)     # (B*S, B*S)
        s = s + mask
        s = s - jnp.max(s, axis=-1, keepdims=True)
        p = jnp.exp(s)
        p = p / jnp.sum(p, axis=-1, keepdims=True)
        oh = jnp.dot(p, vh, preferred_element_type=jnp.float32)         # (B*S, Dh)
        # head contribution through its slice of the (E, E) out-projection
        attn = attn + jnp.dot(oh, w_out_ref[h * Dh:(h + 1) * Dh, :],
                              preferred_element_type=jnp.float32)
    attn = attn + b_out_ref[...]

    # dropout1 is identity (eval mode)
    y = _layernorm(x + attn, g1_ref[...], bt1_ref[...])

    # --- Feed-forward: Linear -> ReLU -> Linear (weights pre-transposed) ---
    h1 = jnp.maximum(
        jnp.dot(y, w1_ref[...], preferred_element_type=jnp.float32) + b1_ref[...], 0.0)
    ff = jnp.dot(h1, w2_ref[...], preferred_element_type=jnp.float32) + b2_ref[...]

    # dropout2 is identity (eval mode)
    o_ref[...] = _layernorm(y + ff, g2_ref[...], bt2_ref[...])


def transformer_encoder_block(x_sbe, params):
    (w_in, b_in, w_out, b_out, g1, bt1, w1, b1, w2, b2, g2, bt2) = params
    S, B, E = x_sbe.shape
    x_flat = jnp.transpose(x_sbe, (1, 0, 2)).reshape(B * S, E)          # (B*S, E)

    # Wrapper-side (loop-invariant) prep:
    #  * fold 1/sqrt(Dh) into the Q rows of the in-projection weight & bias,
    #  * pre-transpose all weights so the kernel does plain x @ W.
    scale = 1.0 / (HEAD_DIM ** 0.5)
    qk_scale = jnp.concatenate(
        [jnp.full((E,), scale, jnp.float32), jnp.ones((2 * E,), jnp.float32)])
    w_in_t = (w_in * qk_scale[:, None]).T                # (E, 3E)
    b_in_s = b_in * qk_scale[None, :]                    # (1, 3E)
    w_out_t = w_out.T                                    # (E, E)
    w1_t = w1.T                                          # (E, HIDDEN)
    w2_t = w2.T                                          # (HIDDEN, E)

    # Additive block-diagonal mask so the folded batch rows never attend
    # across batch elements.
    row_batch = jnp.arange(B * S, dtype=jnp.int32) // S
    mask = jnp.where(row_batch[:, None] == row_batch[None, :],
                     0.0, -1e30).astype(jnp.float32)     # (B*S, B*S)

    out = pl.pallas_call(
        encoder_block_kernel,
        out_shape=jax.ShapeDtypeStruct((B * S, E), jnp.float32),
    )(x_flat, mask, w_in_t, b_in_s, w_out_t, b_out,
      g1, bt1, w1_t, b1, w2_t, b2, g2, bt2)

    return jnp.transpose(out.reshape(B, S, E), (1, 0, 2))               # back to (S, B, E)


def reference(x_sbe, params):
    (w_in, b_in, w_out, b_out, g1, bt1, w1, b1, w2, b2, g2, bt2) = params
    x = jnp.transpose(x_sbe, (1, 0, 2))                  # (B, S, E)
    qkv = jnp.einsum('bse,fe->bsf', x, w_in) + b_in[0]
    q, k, v = jnp.split(qkv, 3, axis=-1)

    def split_heads(t):
        return t.reshape(BATCH, SEQ, NUM_HEADS, HEAD_DIM).transpose(0, 2, 1, 3)

    qh, kh, vh = map(split_heads, (q, k, v))
    s = jnp.einsum('bhsd,bhtd->bhst', qh * (1.0 / HEAD_DIM ** 0.5), kh)
    p = jax.nn.softmax(s, axis=-1)
    o = jnp.einsum('bhst,bhtd->bhsd', p, vh).transpose(0, 2, 1, 3).reshape(BATCH, SEQ, EMBED_DIM)
    attn = jnp.einsum('bse,fe->bsf', o, w_out) + b_out[0]
    y = _layernorm(x + attn, g1[0], bt1[0])
    h1 = jnp.maximum(jnp.einsum('bse,fe->bsf', y, w1) + b1[0], 0.0)
    ff = jnp.einsum('bsf,ef->bse', h1, w2) + b2[0]
    y2 = _layernorm(y + ff, g2[0], bt2[0])
    return jnp.transpose(y2, (1, 0, 2))


def make_params(key):
    ks = jax.random.split(key, 8)
    E, Hd = EMBED_DIM, HIDDEN
    w_in = 0.1 * jax.random.normal(ks[0], (3 * E, E), jnp.float32)
    b_in = 0.05 * jax.random.normal(ks[1], (1, 3 * E), jnp.float32)
    w_out = 0.1 * jax.random.normal(ks[2], (E, E), jnp.float32)
    b_out = 0.05 * jax.random.normal(ks[3], (1, E), jnp.float32)
    g1 = jnp.ones((1, E), jnp.float32)
    bt1 = jnp.zeros((1, E), jnp.float32)
    w1 = 0.1 * jax.random.normal(ks[4], (Hd, E), jnp.float32)
    b1 = 0.05 * jax.random.normal(ks[5], (1, Hd), jnp.float32)
    w2 = 0.1 * jax.random.normal(ks[6], (E, Hd), jnp.float32)
    b2 = 0.05 * jax.random.normal(ks[7], (1, E), jnp.float32)
    g2 = jnp.ones((1, E), jnp.float32)
    bt2 = jnp.zeros((1, E), jnp.float32)
    return (w_in, b_in, w_out, b_out, g1, bt1, w1, b1, w2, b2, g2, bt2)


if __name__ == "__main__":
    key = jax.random.PRNGKey(0)
    kx, kp = jax.random.split(key)
    # x: (seq, batch, embed) — PyTorch MultiheadAttention default layout
    x = jax.random.normal(kx, (SEQ, BATCH, EMBED_DIM), jnp.float32)
    params = make_params(kp)

    out = transformer_encoder_block(x, params)
    out = jax.block_until_ready(out)

    ref = reference(x, params)
    assert out.shape == (SEQ, BATCH, EMBED_DIM)
    assert jnp.allclose(out, ref, atol=1e-4, rtol=1e-4), "Pallas output mismatch vs JAX reference"
    print("KERNEL_OK")
</pallas_src>

<mosaic_0001>
module attributes {stable_mosaic.version = 11 : i64} {
  func.func @encoder_block_kernel(%arg0: memref<16x32xf32, #tpu.memory_space<vmem>>, %arg1: memref<16x16xf32, #tpu.memory_space<vmem>>, %arg2: memref<32x96xf32, #tpu.memory_space<vmem>>, %arg3: memref<1x96xf32, #tpu.memory_space<vmem>>, %arg4: memref<32x32xf32, #tpu.memory_space<vmem>>, %arg5: memref<1x32xf32, #tpu.memory_space<vmem>>, %arg6: memref<1x32xf32, #tpu.memory_space<vmem>>, %arg7: memref<1x32xf32, #tpu.memory_space<vmem>>, %arg8: memref<32x128xf32, #tpu.memory_space<vmem>>, %arg9: memref<1x128xf32, #tpu.memory_space<vmem>>, %arg10: memref<128x32xf32, #tpu.memory_space<vmem>>, %arg11: memref<1x32xf32, #tpu.memory_space<vmem>>, %arg12: memref<1x32xf32, #tpu.memory_space<vmem>>, %arg13: memref<1x32xf32, #tpu.memory_space<vmem>>, %arg14: memref<16x32xf32, #tpu.memory_space<vmem>>) attributes {dimension_semantics = [], scalar_prefetch = 0 : i64, scratch_operands = 0 : i64, tpu.core_type = #tpu.core_type<tc>} {
    %c0 = arith.constant 0 : index
    %c0_0 = arith.constant 0 : index
    %0 = vector.load %arg0[%c0, %c0_0] : memref<16x32xf32, #tpu.memory_space<vmem>>, vector<16x32xf32>
    %c0_1 = arith.constant 0 : index
    %c0_2 = arith.constant 0 : index
    %1 = vector.load %arg2[%c0_1, %c0_2] : memref<32x96xf32, #tpu.memory_space<vmem>>, vector<32x96xf32>
    %cst = arith.constant dense<0.000000e+00> : vector<16x96xf32>
    %2 = tpu.matmul %0, %1, %cst {dimension_numbers = #tpu.dot_dimension_numbers<[1], [0], [0], [1], [0, 0, 1, 1], [], []>} : vector<16x32xf32>, vector<32x96xf32>, vector<16x96xf32> -> vector<16x96xf32>
    %c0_3 = arith.constant 0 : index
    %c0_4 = arith.constant 0 : index
    %3 = vector.load %arg3[%c0_3, %c0_4] : memref<1x96xf32, #tpu.memory_space<vmem>>, vector<1x96xf32>
    %4 = vector.broadcast %3 : vector<1x96xf32> to vector<16x96xf32>
    %5 = arith.addf %2, %4 : vector<16x96xf32>
    %6 = vector.extract_strided_slice %5 {offsets = [0, 0], sizes = [16, 32], strides = [1, 1]} : vector<16x96xf32> to vector<16x32xf32>
    %7 = vector.extract_strided_slice %5 {offsets = [0, 32], sizes = [16, 32], strides = [1, 1]} : vector<16x96xf32> to vector<16x32xf32>
    %8 = vector.extract_strided_slice %5 {offsets = [0, 64], sizes = [16, 32], strides = [1, 1]} : vector<16x96xf32> to vector<16x32xf32>
    %c0_5 = arith.constant 0 : index
    %c0_6 = arith.constant 0 : index
    %9 = vector.load %arg1[%c0_5, %c0_6] : memref<16x16xf32, #tpu.memory_space<vmem>>, vector<16x16xf32>
    %cst_7 = arith.constant 0.000000e+00 : f32
    %10 = vector.broadcast %cst_7 : f32 to vector<16x32xf32>
    %11 = vector.extract_strided_slice %6 {offsets = [0, 0], sizes = [16, 8], strides = [1, 1]} : vector<16x32xf32> to vector<16x8xf32>
    %12 = vector.extract_strided_slice %7 {offsets = [0, 0], sizes = [16, 8], strides = [1, 1]} : vector<16x32xf32> to vector<16x8xf32>
    %13 = vector.extract_strided_slice %8 {offsets = [0, 0], sizes = [16, 8], strides = [1, 1]} : vector<16x32xf32> to vector<16x8xf32>
    %cst_8 = arith.constant dense<0.000000e+00> : vector<16x16xf32>
    %14 = tpu.matmul %11, %12, %cst_8 {dimension_numbers = #tpu.dot_dimension_numbers<[1], [1], [0], [0], [0, 0, 1, 0], [], []>} : vector<16x8xf32>, vector<16x8xf32>, vector<16x16xf32> -> vector<16x16xf32>
    %15 = arith.addf %14, %9 : vector<16x16xf32>
    %cst_9 = arith.constant dense<0xFF800000> : vector<16xf32>
    %16 = vector.multi_reduction <maximumf>, %15, %cst_9 [1] : vector<16x16xf32> to vector<16xf32>
    %17 = vector.shape_cast %16 : vector<16xf32> to vector<16x1xf32>
    %18 = vector.broadcast %17 : vector<16x1xf32> to vector<16x16xf32>
    %19 = arith.subf %15, %18 : vector<16x16xf32>
    %20 = math.exp %19 : vector<16x16xf32>
    %cst_10 = arith.constant dense<0.000000e+00> : vector<16xf32>
    %21 = vector.multi_reduction <add>, %20, %cst_10 [1] : vector<16x16xf32> to vector<16xf32>
    %22 = vector.shape_cast %21 : vector<16xf32> to vector<16x1xf32>
    %23 = vector.broadcast %22 : vector<16x1xf32> to vector<16x16xf32>
    %24 = arith.divf %20, %23 : vector<16x16xf32>
    %cst_11 = arith.constant dense<0.000000e+00> : vector<16x8xf32>
    %25 = tpu.matmul %24, %13, %cst_11 {dimension_numbers = #tpu.dot_dimension_numbers<[1], [0], [0], [1], [0, 0, 1, 1], [], []>} : vector<16x16xf32>, vector<16x8xf32>, vector<16x8xf32> -> vector<16x8xf32>
    %c0_12 = arith.constant 0 : index
    %c0_13 = arith.constant 0 : index
    %26 = vector.load %arg4[%c0_12, %c0_13] : memref<32x32xf32, #tpu.memory_space<vmem>>, vector<8x32xf32>
    %cst_14 = arith.constant dense<0.000000e+00> : vector<16x32xf32>
    %27 = tpu.matmul %25, %26, %cst_14 {dimension_numbers = #tpu.dot_dimension_numbers<[1], [0], [0], [1], [0, 0, 1, 1], [], []>} : vector<16x8xf32>, vector<8x32xf32>, vector<16x32xf32> -> vector<16x32xf32>
    %28 = arith.addf %10, %27 : vector<16x32xf32>
    %29 = vector.extract_strided_slice %6 {offsets = [0, 8], sizes = [16, 8], strides = [1, 1]} : vector<16x32xf32> to vector<16x8xf32>
    %30 = vector.extract_strided_slice %7 {offsets = [0, 8], sizes = [16, 8], strides = [1, 1]} : vector<16x32xf32> to vector<16x8xf32>
    %31 = vector.extract_strided_slice %8 {offsets = [0, 8], sizes = [16, 8], strides = [1, 1]} : vector<16x32xf32> to vector<16x8xf32>
    %cst_15 = arith.constant dense<0.000000e+00> : vector<16x16xf32>
    %32 = tpu.matmul %29, %30, %cst_15 {dimension_numbers = #tpu.dot_dimension_numbers<[1], [1], [0], [0], [0, 0, 1, 0], [], []>} : vector<16x8xf32>, vector<16x8xf32>, vector<16x16xf32> -> vector<16x16xf32>
    %33 = arith.addf %32, %9 : vector<16x16xf32>
    %cst_16 = arith.constant dense<0xFF800000> : vector<16xf32>
    %34 = vector.multi_reduction <maximumf>, %33, %cst_16 [1] : vector<16x16xf32> to vector<16xf32>
    %35 = vector.shape_cast %34 : vector<16xf32> to vector<16x1xf32>
    %36 = vector.broadcast %35 : vector<16x1xf32> to vector<16x16xf32>
    %37 = arith.subf %33, %36 : vector<16x16xf32>
    %38 = math.exp %37 : vector<16x16xf32>
    %cst_17 = arith.constant dense<0.000000e+00> : vector<16xf32>
    %39 = vector.multi_reduction <add>, %38, %cst_17 [1] : vector<16x16xf32> to vector<16xf32>
    %40 = vector.shape_cast %39 : vector<16xf32> to vector<16x1xf32>
    %41 = vector.broadcast %40 : vector<16x1xf32> to vector<16x16xf32>
    %42 = arith.divf %38, %41 : vector<16x16xf32>
    %cst_18 = arith.constant dense<0.000000e+00> : vector<16x8xf32>
    %43 = tpu.matmul %42, %31, %cst_18 {dimension_numbers = #tpu.dot_dimension_numbers<[1], [0], [0], [1], [0, 0, 1, 1], [], []>} : vector<16x16xf32>, vector<16x8xf32>, vector<16x8xf32> -> vector<16x8xf32>
    %c8 = arith.constant 8 : index
    %c0_19 = arith.constant 0 : index
    %44 = vector.load %arg4[%c8, %c0_19] : memref<32x32xf32, #tpu.memory_space<vmem>>, vector<8x32xf32>
    %cst_20 = arith.constant dense<0.000000e+00> : vector<16x32xf32>
    %45 = tpu.matmul %43, %44, %cst_20 {dimension_numbers = #tpu.dot_dimension_numbers<[1], [0], [0], [1], [0, 0, 1, 1], [], []>} : vector<16x8xf32>, vector<8x32xf32>, vector<16x32xf32> -> vector<16x32xf32>
    %46 = arith.addf %28, %45 : vector<16x32xf32>
    %47 = vector.extract_strided_slice %6 {offsets = [0, 16], sizes = [16, 8], strides = [1, 1]} : vector<16x32xf32> to vector<16x8xf32>
    %48 = vector.extract_strided_slice %7 {offsets = [0, 16], sizes = [16, 8], strides = [1, 1]} : vector<16x32xf32> to vector<16x8xf32>
    %49 = vector.extract_strided_slice %8 {offsets = [0, 16], sizes = [16, 8], strides = [1, 1]} : vector<16x32xf32> to vector<16x8xf32>
    %cst_21 = arith.constant dense<0.000000e+00> : vector<16x16xf32>
    %50 = tpu.matmul %47, %48, %cst_21 {dimension_numbers = #tpu.dot_dimension_numbers<[1], [1], [0], [0], [0, 0, 1, 0], [], []>} : vector<16x8xf32>, vector<16x8xf32>, vector<16x16xf32> -> vector<16x16xf32>
    %51 = arith.addf %50, %9 : vector<16x16xf32>
    %cst_22 = arith.constant dense<0xFF800000> : vector<16xf32>
    %52 = vector.multi_reduction <maximumf>, %51, %cst_22 [1] : vector<16x16xf32> to vector<16xf32>
    %53 = vector.shape_cast %52 : vector<16xf32> to vector<16x1xf32>
    %54 = vector.broadcast %53 : vector<16x1xf32> to vector<16x16xf32>
    %55 = arith.subf %51, %54 : vector<16x16xf32>
    %56 = math.exp %55 : vector<16x16xf32>
    %cst_23 = arith.constant dense<0.000000e+00> : vector<16xf32>
    %57 = vector.multi_reduction <add>, %56, %cst_23 [1] : vector<16x16xf32> to vector<16xf32>
    %58 = vector.shape_cast %57 : vector<16xf32> to vector<16x1xf32>
    %59 = vector.broadcast %58 : vector<16x1xf32> to vector<16x16xf32>
    %60 = arith.divf %56, %59 : vector<16x16xf32>
    %cst_24 = arith.constant dense<0.000000e+00> : vector<16x8xf32>
    %61 = tpu.matmul %60, %49, %cst_24 {dimension_numbers = #tpu.dot_dimension_numbers<[1], [0], [0], [1], [0, 0, 1, 1], [], []>} : vector<16x16xf32>, vector<16x8xf32>, vector<16x8xf32> -> vector<16x8xf32>
    %c16 = arith.constant 16 : index
    %c0_25 = arith.constant 0 : index
    %62 = vector.load %arg4[%c16, %c0_25] : memref<32x32xf32, #tpu.memory_space<vmem>>, vector<8x32xf32>
    %cst_26 = arith.constant dense<0.000000e+00> : vector<16x32xf32>
    %63 = tpu.matmul %61, %62, %cst_26 {dimension_numbers = #tpu.dot_dimension_numbers<[1], [0], [0], [1], [0, 0, 1, 1], [], []>} : vector<16x8xf32>, vector<8x32xf32>, vector<16x32xf32> -> vector<16x32xf32>
    %64 = arith.addf %46, %63 : vector<16x32xf32>
    %65 = vector.extract_strided_slice %6 {offsets = [0, 24], sizes = [16, 8], strides = [1, 1]} : vector<16x32xf32> to vector<16x8xf32>
    %66 = vector.extract_strided_slice %7 {offsets = [0, 24], sizes = [16, 8], strides = [1, 1]} : vector<16x32xf32> to vector<16x8xf32>
    %67 = vector.extract_strided_slice %8 {offsets = [0, 24], sizes = [16, 8], strides = [1, 1]} : vector<16x32xf32> to vector<16x8xf32>
    %cst_27 = arith.constant dense<0.000000e+00> : vector<16x16xf32>
    %68 = tpu.matmul %65, %66, %cst_27 {dimension_numbers = #tpu.dot_dimension_numbers<[1], [1], [0], [0], [0, 0, 1, 0], [], []>} : vector<16x8xf32>, vector<16x8xf32>, vector<16x16xf32> -> vector<16x16xf32>
    %69 = arith.addf %68, %9 : vector<16x16xf32>
    %cst_28 = arith.constant dense<0xFF800000> : vector<16xf32>
    %70 = vector.multi_reduction <maximumf>, %69, %cst_28 [1] : vector<16x16xf32> to vector<16xf32>
    %71 = vector.shape_cast %70 : vector<16xf32> to vector<16x1xf32>
    %72 = vector.broadcast %71 : vector<16x1xf32> to vector<16x16xf32>
    %73 = arith.subf %69, %72 : vector<16x16xf32>
    %74 = math.exp %73 : vector<16x16xf32>
    %cst_29 = arith.constant dense<0.000000e+00> : vector<16xf32>
    %75 = vector.multi_reduction <add>, %74, %cst_29 [1] : vector<16x16xf32> to vector<16xf32>
    %76 = vector.shape_cast %75 : vector<16xf32> to vector<16x1xf32>
    %77 = vector.broadcast %76 : vector<16x1xf32> to vector<16x16xf32>
    %78 = arith.divf %74, %77 : vector<16x16xf32>
    %cst_30 = arith.constant dense<0.000000e+00> : vector<16x8xf32>
    %79 = tpu.matmul %78, %67, %cst_30 {dimension_numbers = #tpu.dot_dimension_numbers<[1], [0], [0], [1], [0, 0, 1, 1], [], []>} : vector<16x16xf32>, vector<16x8xf32>, vector<16x8xf32> -> vector<16x8xf32>
    %c24 = arith.constant 24 : index
    %c0_31 = arith.constant 0 : index
    %80 = vector.load %arg4[%c24, %c0_31] : memref<32x32xf32, #tpu.memory_space<vmem>>, vector<8x32xf32>
    %cst_32 = arith.constant dense<0.000000e+00> : vector<16x32xf32>
    %81 = tpu.matmul %79, %80, %cst_32 {dimension_numbers = #tpu.dot_dimension_numbers<[1], [0], [0], [1], [0, 0, 1, 1], [], []>} : vector<16x8xf32>, vector<8x32xf32>, vector<16x32xf32> -> vector<16x32xf32>
    %82 = arith.addf %64, %81 : vector<16x32xf32>
    %c0_33 = arith.constant 0 : index
    %c0_34 = arith.constant 0 : index
    %83 = vector.load %arg5[%c0_33, %c0_34] : memref<1x32xf32, #tpu.memory_space<vmem>>, vector<1x32xf32>
    %84 = vector.broadcast %83 : vector<1x32xf32> to vector<16x32xf32>
    %85 = arith.addf %82, %84 : vector<16x32xf32>
    %86 = arith.addf %0, %85 : vector<16x32xf32>
    %c0_35 = arith.constant 0 : index
    %c0_36 = arith.constant 0 : index
    %87 = vector.load %arg6[%c0_35, %c0_36] : memref<1x32xf32, #tpu.memory_space<vmem>>, vector<1x32xf32>
    %c0_37 = arith.constant 0 : index
    %c0_38 = arith.constant 0 : index
    %88 = vector.load %arg7[%c0_37, %c0_38] : memref<1x32xf32, #tpu.memory_space<vmem>>, vector<1x32xf32>
    %cst_39 = arith.constant dense<0.000000e+00> : vector<16xf32>
    %89 = vector.multi_reduction <add>, %86, %cst_39 [1] : vector<16x32xf32> to vector<16xf32>
    %90 = vector.shape_cast %89 : vector<16xf32> to vector<16x1xf32>
    %cst_40 = arith.constant 3.200000e+01 : f32
    %91 = vector.broadcast %cst_40 : f32 to vector<16x1xf32>
    %92 = arith.divf %90, %91 : vector<16x1xf32>
    %93 = vector.broadcast %92 : vector<16x1xf32> to vector<16x32xf32>
    %94 = arith.subf %86, %93 : vector<16x32xf32>
    %95 = arith.mulf %94, %94 : vector<16x32xf32>
    %cst_41 = arith.constant dense<0.000000e+00> : vector<16xf32>
    %96 = vector.multi_reduction <add>, %95, %cst_41 [1] : vector<16x32xf32> to vector<16xf32>
    %97 = vector.shape_cast %96 : vector<16xf32> to vector<16x1xf32>
    %cst_42 = arith.constant 3.200000e+01 : f32
    %98 = vector.broadcast %cst_42 : f32 to vector<16x1xf32>
    %99 = arith.divf %97, %98 : vector<16x1xf32>
    %100 = vector.broadcast %92 : vector<16x1xf32> to vector<16x32xf32>
    %101 = arith.subf %86, %100 : vector<16x32xf32>
    %cst_43 = arith.constant 9.99999974E-6 : f32
    %102 = vector.broadcast %cst_43 : f32 to vector<16x1xf32>
    %103 = arith.addf %99, %102 : vector<16x1xf32>
    %104 = math.rsqrt %103 : vector<16x1xf32>
    %105 = vector.broadcast %104 : vector<16x1xf32> to vector<16x32xf32>
    %106 = arith.mulf %101, %105 : vector<16x32xf32>
    %107 = vector.broadcast %87 : vector<1x32xf32> to vector<16x32xf32>
    %108 = arith.mulf %106, %107 : vector<16x32xf32>
    %109 = vector.broadcast %88 : vector<1x32xf32> to vector<16x32xf32>
    %110 = arith.addf %108, %109 : vector<16x32xf32>
    %c0_44 = arith.constant 0 : index
    %c0_45 = arith.constant 0 : index
    %111 = vector.load %arg8[%c0_44, %c0_45] : memref<32x128xf32, #tpu.memory_space<vmem>>, vector<32x128xf32>
    %cst_46 = arith.constant dense<0.000000e+00> : vector<16x128xf32>
    %112 = tpu.matmul %110, %111, %cst_46 {dimension_numbers = #tpu.dot_dimension_numbers<[1], [0], [0], [1], [0, 0, 1, 1], [], []>} : vector<16x32xf32>, vector<32x128xf32>, vector<16x128xf32> -> vector<16x128xf32>
    %c0_47 = arith.constant 0 : index
    %c0_48 = arith.constant 0 : index
    %113 = vector.load %arg9[%c0_47, %c0_48] : memref<1x128xf32, #tpu.memory_space<vmem>>, vector<1x128xf32>
    %114 = vector.broadcast %113 : vector<1x128xf32> to vector<16x128xf32>
    %115 = arith.addf %112, %114 : vector<16x128xf32>
    %cst_49 = arith.constant 0.000000e+00 : f32
    %116 = vector.broadcast %cst_49 : f32 to vector<16x128xf32>
    %117 = arith.maximumf %115, %116 : vector<16x128xf32>
    %c0_50 = arith.constant 0 : index
    %c0_51 = arith.constant 0 : index
    %118 = vector.load %arg10[%c0_50, %c0_51] : memref<128x32xf32, #tpu.memory_space<vmem>>, vector<128x32xf32>
    %cst_52 = arith.constant dense<0.000000e+00> : vector<16x32xf32>
    %119 = tpu.matmul %117, %118, %cst_52 {dimension_numbers = #tpu.dot_dimension_numbers<[1], [0], [0], [1], [0, 0, 1, 1], [], []>} : vector<16x128xf32>, vector<128x32xf32>, vector<16x32xf32> -> vector<16x32xf32>
    %c0_53 = arith.constant 0 : index
    %c0_54 = arith.constant 0 : index
    %120 = vector.load %arg11[%c0_53, %c0_54] : memref<1x32xf32, #tpu.memory_space<vmem>>, vector<1x32xf32>
    %121 = vector.broadcast %120 : vector<1x32xf32> to vector<16x32xf32>
    %122 = arith.addf %119, %121 : vector<16x32xf32>
    %123 = arith.addf %110, %122 : vector<16x32xf32>
    %c0_55 = arith.constant 0 : index
    %c0_56 = arith.constant 0 : index
    %124 = vector.load %arg12[%c0_55, %c0_56] : memref<1x32xf32, #tpu.memory_space<vmem>>, vector<1x32xf32>
    %c0_57 = arith.constant 0 : index
    %c0_58 = arith.constant 0 : index
    %125 = vector.load %arg13[%c0_57, %c0_58] : memref<1x32xf32, #tpu.memory_space<vmem>>, vector<1x32xf32>
    %cst_59 = arith.constant dense<0.000000e+00> : vector<16xf32>
    %126 = vector.multi_reduction <add>, %123, %cst_59 [1] : vector<16x32xf32> to vector<16xf32>
    %127 = vector.shape_cast %126 : vector<16xf32> to vector<16x1xf32>
    %cst_60 = arith.constant 3.200000e+01 : f32
    %128 = vector.broadcast %cst_60 : f32 to vector<16x1xf32>
    %129 = arith.divf %127, %128 : vector<16x1xf32>
    %130 = vector.broadcast %129 : vector<16x1xf32> to vector<16x32xf32>
    %131 = arith.subf %123, %130 : vector<16x32xf32>
    %132 = arith.mulf %131, %131 : vector<16x32xf32>
    %cst_61 = arith.constant dense<0.000000e+00> : vector<16xf32>
    %133 = vector.multi_reduction <add>, %132, %cst_61 [1] : vector<16x32xf32> to vector<16xf32>
    %134 = vector.shape_cast %133 : vector<16xf32> to vector<16x1xf32>
    %cst_62 = arith.constant 3.200000e+01 : f32
    %135 = vector.broadcast %cst_62 : f32 to vector<16x1xf32>
    %136 = arith.divf %134, %135 : vector<16x1xf32>
    %137 = vector.broadcast %129 : vector<16x1xf32> to vector<16x32xf32>
    %138 = arith.subf %123, %137 : vector<16x32xf32>
    %cst_63 = arith.constant 9.99999974E-6 : f32
    %139 = vector.broadcast %cst_63 : f32 to vector<16x1xf32>
    %140 = arith.addf %136, %139 : vector<16x1xf32>
    %141 = math.rsqrt %140 : vector<16x1xf32>
    %142 = vector.broadcast %141 : vector<16x1xf32> to vector<16x32xf32>
    %143 = arith.mulf %138, %142 : vector<16x32xf32>
    %144 = vector.broadcast %124 : vector<1x32xf32> to vector<16x32xf32>
    %145 = arith.mulf %143, %144 : vector<16x32xf32>
    %146 = vector.broadcast %125 : vector<1x32xf32> to vector<16x32xf32>
    %147 = arith.addf %145, %146 : vector<16x32xf32>
    %c0_64 = arith.constant 0 : index
    %c0_65 = arith.constant 0 : index
    %148 = vector.load %arg14[%c0_64, %c0_65] : memref<16x32xf32, #tpu.memory_space<vmem>>, vector<16x32xf32>
    tpu.vector_store %arg14[%c0_64, %c0_65], %147 {strides = array<i32>} : memref<16x32xf32, #tpu.memory_space<vmem>>, vector<16x32xf32>,
    return
  }
}

</mosaic_0001>

<bundles_post_ra>
// kernel: tpu_custom_call.1
= control target key start
LH: loop header
LB: loop body
LE: loop exit
PB: predicated region body
PF: predicated region fallthrough
CT: control target
= control target key end

     0   :  { %vm61_vm0 = vcmask 261120   ;;  %s2406_s0 = inlined_call_operand.vmem [shape: f32[16,32], index: 0, kind: input, shape index: {}]   ;;  %s2407_s1 = inlined_call_operand.vmem [shape: f32[16,16], index: 1, kind: input, shape index: {}]   ;;  %s2408_s2 = inlined_call_operand.vmem [shape: f32[32,96], index: 2, kind: input, shape index: {}]   ;;  %s2409_s3 = inlined_call_operand.vmem [shape: f32[1,96], index: 3, kind: input, shape index: {}]   ;;  %s2410_s4 = inlined_call_operand.vmem [shape: f32[32,32], index: 4, kind: input, shape index: {}]   ;;  %s2411_s5 = inlined_call_operand.vmem [shape: f32[1,32], index: 5, kind: input, shape index: {}]   ;;  %s2412_s6 = inlined_call_operand.vmem [shape: f32[1,32], index: 6, kind: input, shape index: {}]   ;;  %s2413_s7 = inlined_call_operand.vmem [shape: f32[1,32], index: 7, kind: input, shape index: {}]   ;;  %s2414_s8 = inlined_call_operand.vmem [shape: f32[32,128], index: 8, kind: input, shape index: {}]   ;;  %s2415_s9 = inlined_call_operand.vmem [shape: f32[1,128], index: 9, kind: input, shape index: {}]   ;;  %s2416_s10 = inlined_call_operand.vmem [shape: f32[128,32], index: 10, kind: input, shape index: {}]   ;;  %s2417_s11 = inlined_call_operand.vmem [shape: f32[1,32], index: 11, kind: input, shape index: {}]   ;;  %s2418_s12 = inlined_call_operand.vmem [shape: f32[1,32], index: 12, kind: input, shape index: {}]   ;;  %s2419_s13 = inlined_call_operand.vmem [shape: f32[1,32], index: 13, kind: input, shape index: {}]   ;;  %s2420_s14 = inlined_call_operand.hbm [shape: f32[16,32], index: 14, kind: output, shape index: {}]  }
   0x1   :  { %v50_v0 = vld [vmem:[%s2408_s2] sm:$0xff]  ;;  %v51_v1 = vld [vmem:[%s2408_s2 + $0x8] sm:$0xff]  ;;  %v52_v2 = vld [vmem:[%s2408_s2 + $0x10] sm:$0xff] }
   0x2   :  { %v1840_v3 = vpack.c.bf16 %v51_v1, %v50_v0  ;;  %v53_v4 = vld [vmem:[%s2408_s2 + $0x18] sm:$0xff]  ;;  %v2156_v5 = vld [vmem:[%s2406_s0] sm:$0xff] }
   0x3   :  { %v1844_v6 = vpack.c.bf16 %v53_v4, %v52_v2  ;;  %1715 = vmatprep.mubr.msk.f32.mxu1 %vm61_vm0, %v2156_v5 }
   0x4   :  { %19 = vsyncpa [#allocation3], 0  ;;  %1841 = vmatprep.subr.bf16.mxu1 %v1840_v3  ;;  %v2163_v7 = vld [vmem:[%s2406_s0 + $0x8] sm:$0xff]  ;;  %v1589_v8 = vld [vmem:[%s2409_s3] ss:$0 sm:$0xff]  ;;  %vm151_vm1 = vcmask 64512  }
   0x5   :  { %1843 = vmatpush3.bf16.msra.mxu1 %v1840_v3  ;;  %s2052_s0 = smov 96   ;;  %vm2183_vm2 = vmpackc.low %vm151_vm1, %vm151_vm1  ;;  %v2196_v19 = vld [vmem:[%s2407_s1 + $0x8] sm:$0xff]  ;;  %v2201_v20 = vld [vmem:[%s2407_s1] sm:$0xff]  ;;  %vm235_vm3 = vcmask 130048   ;;  %s2053_s29 = smov 64  }
   0x6   :  { %1845 = vmatprep.subr.bf16.mxu1 %v1844_v6  ;;  %s2054_s30 = smov 88   ;;  %s2055_s1 = smov 120  }
   0x7   :  { %s2056_s15 = smov 56   ;;  %s2057_s16 = smov 80  }
   0x8   :  { %s2058_s17 = smov 112   ;;  %s2059_s18 = smov 104  }
   0x9   :  { %1847 = vmatpush3.bf16.msra.mxu1 %v1844_v6  ;;  %s2060_s19 = smov 72   ;;  %s2061_s24 = smov 48  }
   0xa   :  { %s2062_s2 = smov 40  }
   0xc   :  { %1716 = vmatmul.mubr.msk.f32.vlgmr.msra.gmra.mrb[0].mxu1 %vm61_vm0, %v2163_v7 }
  0xdf   :  { %v1717_v9 = vpop.f32.mrb[0].mxu1 }
  0xe0   :  { %v2170_v10 = vadd.f32 %v1717_v9, %v1589_v8  ;;  %v134_v11 = vpop.f32.mrb[1].mxu1 }
  0xe1   :  { %v2172_v12 = vadd.f32 %v1589_v8, %v134_v11 }
  0xe3   :  { %1722 = vmatprep.mubr.msk.f32.mxu1 %vm151_vm1, %v2172_v12  ;;  %v2178_v13 = vpack.i.bf16 %v2170_v10, %v2172_v12 }
  0xe5   :  { %1949 = vrot.lane.b32.xlu0 %v2178_v13, %s2052_s0 }
 0x157   :  { %v1950_v14 = vpop.permute.xlu0 %1949 }
 0x158   :  { %v1952_v15 = vunpack.i.h.bf16 %v1950_v14  ;;  %v1951_v16 = vunpack.i.l.bf16 %v1950_v14 }
 0x15a   :  { %v1848_v18 = vpack.c.bf16 %v1952_v15, %v1951_v16 }
 0x15c   :  { %1850 = vmatprep.subr.msk.bf16.mxu1 %vm2183_vm2, %v1848_v18 }
 0x15d   :  { %1853 = vmatpush3.bf16.xpose.msk.msra.mxu1 %vm2183_vm2, %v1848_v18 }
 0x164   :  { %1723 = vmatmul.mubr.msk.f32.vlgmr.msra.gmra.mrb[2].mxu1 %vm151_vm1, %v2170_v10 }
 0x237   :  { %v1724_v21 = vpop.f32.mrb[2].mxu1 }
 0x238   :  { %v232_v22 = vadd.f32 %v1724_v21, %v2196_v19  ;;  %v226_v23 = vpop.f32.mrb[3].mxu1 }
 0x239   :  { %v227_v24 = vadd.f32 %v226_v23, %v2201_v20 }
 0x23a   :  { %v239_v25 = vsel %vm235_vm3, %v232_v22, -inf }
 0x23b   :  { %240 = vmax.xlane.f32.xlu1 %v239_v25  ;;  %v236_v26 = vsel %vm235_vm3, %v227_v24, -inf }
 0x23c   :  { %237 = vmax.xlane.f32.xlu0 %v236_v26 }
 0x24c   :  { %1954 = vrot.lane.b32.xlu1 %v2178_v13, %s2053_s29 }
 0x250   :  { %1959 = vrot.lane.b32.xlu1 %v2178_v13, %s2054_s30 }
 0x252   :  { %348 = vrot.lane.b32.xlu0 %v2170_v10, %s2055_s1 }
 0x2c8   :  { %v241_v27 = vpop.xlane.xlu1 %240 }
 0x2c9   :  { %v243_v28 = vsub.f32 %v232_v22, %v241_v27  ;;  %v238_v29 = vpop.xlane.xlu0 %237 }
 0x2ca   :  { %v242_v30 = vsub.f32 %v227_v24, %v238_v29 }
 0x2cb   :  { %v246_v31 = vmul.f32 1.442695, %v243_v28 }
 0x2cc   :  { %v244_v32 = vmul.f32 1.442695, %v242_v30  ;;  %v1955_v33 = vpop.permute.xlu1 %1954 }
 0x2cd   :  { %1988 = vpow2.f32 %v246_v31  ;;  %v1957_v34 = vunpack.i.h.bf16 %v1955_v33  ;;  %v1956_v35 = vunpack.i.l.bf16 %v1955_v33  ;;  %v349_v52 = vpop.permute.xlu0 %348 }
 0x2ce   :  { %1990 = vpow2.f32 %v244_v32 }
 0x2cf   :  { %v1854_v36 = vpack.c.bf16 %v1957_v34, %v1956_v35  ;;  %v546_v35 = vld [vmem:[%s2410_s4 + $0x8] sm:$0xff] }
 0x2d0   :  { %v1960_v37 = vpop.permute.xlu1 %1959  ;;  %1746 = vmatprep.subr.mxu0 %v546_v35 }
 0x2d1   :  { %v1962_v38 = vunpack.i.h.bf16 %v1960_v37  ;;  %v1961_v39 = vunpack.i.l.bf16 %v1960_v37  ;;  %1855 = vmatprep.subr.bf16.mxu1 %v1854_v36  ;;  %1747 = vmatpush3.msra.mxu0 %v546_v35  ;;  %v1624_v35 = vld [vmem:[%s2411_s5] ss:$0 sm:$0xff]  ;;  %s2063_s5 = smov [#allocation2]  }
 0x2d2   :  { %1857 = vmatpush3.bf16.msra.mxu1 %v1854_v36  ;;  %v345_v36 = vld [vmem:[%s2410_s4] sm:$0xff]  ;;  %s1578_s29 = sshll.u32 %s2063_s5, 4  ;;  %s1579_s29 = int_to_ptr.vmem [resolvable:$true] %s1578_s29 }
 0x2d3   :  { %v1858_v40 = vpack.c.bf16 %v1962_v38, %v1961_v39  ;;  %1751 = vmatprep.subr.mxu0 %v345_v36  ;;  %s2028_s30 = scalar_lea.vmem %s1579_s29, 256  ;;  %p2033_p1 = scmp.lt.s32.totalorder %s1579_s29, %s1579_s29 }
 0x2d4   :  { %p2029_p0 = scmp.ne.s32.totalorder %s1579_s29, %s2028_s30  ;;  %p2034_p2 = scmp.lt.s32.totalorder %s2028_s30, %s2028_s30 }
 0x2d5   :  { %1860 = vmatprep.subr.msk.bf16.mxu1 %vm2183_vm2, %v1858_v40 }
 0x2d6   :  { %p2035_p3 = por %p2034_p2, %p2033_p1 }
 0x2d7   :  { %v1989_v41 = vpop.eup %1988 }
 0x2d8   :  { %v251_v42 = vsel %vm235_vm3, %v1989_v41, 0.0  ;;  %v1991_v43 = vpop.eup %1990  ;;  %p2036_p4 = pnand %p2035_p3, %p2029_p0 }
 0x2d9   :  { %252 = vadd.xlane.f32.xlu1 %v251_v42  ;;  %v248_v44 = vsel %vm235_vm3, %v1991_v43, 0.0 }
 0x2dd   :  { %249 = vadd.xlane.f32.xlu1 %v248_v44 }
 0x2ee   :  { %346 = vrot.lane.b32.xlu1 %v2172_v12, %s2055_s1 }
 0x366   :  { %v253_v45 = vpop.xlane.xlu1 %252 }
 0x367   :  { %1992 = vrcp.f32 %v253_v45 }
 0x36a   :  { %v250_v46 = vpop.xlane.xlu1 %249 }
 0x36b   :  { %1994 = vrcp.f32 %v250_v46 }
 0x36e   :  { %v347_v51 = vpop.permute.xlu1 %346 }
 0x371   :  { %v1993_v47 = vpop.eup %1992 }
 0x372   :  { %v257_v50 = vmul.f32 %v1993_v47, %v1989_v41 }
 0x375   :  { %v1995_v48 = vpop.eup %1994 }
 0x376   :  { %v255_v49 = vmul.f32 %v1995_v48, %v1991_v43 }
 0x378   :  { %1729 = vmatprep.mubr.msk.f32.mxu1 %vm235_vm3, %v255_v49 }
 0x379   :  { %1730 = vmatmul.mubr.msk.f32.vlgmr.msra.gmra.mrb[4].mxu1 %vm235_vm3, %v257_v50 }
 0x37a   :  { %1863 = vmatpush3.bf16.xpose.msk.msra.mxu1 %vm2183_vm2, %v1858_v40  ;;  %1736 = vmatprep.mubr.msk.f32.mxu1 %vm151_vm1, %v347_v51 }
 0x381   :  { %1737 = vmatmul.mubr.msk.f32.vlgmr.msra.gmra.mrb[6].mxu1 %vm151_vm1, %v349_v52 }
 0x44c   :  { %v2221_v53 = vpop.f32.mrb[4].mxu1 }
 0x44d   :  { %v2223_v54 = vpop.f32.mrb[5].mxu1 }
 0x454   :  { %v1738_v55 = vpop.f32.mrb[6].mxu1 }
 0x455   :  { %v434_v56 = vadd.f32 %v1738_v55, %v2196_v19  ;;  %v428_v57 = vpop.f32.mrb[7].mxu1 }
 0x456   :  { %v429_v58 = vadd.f32 %v428_v57, %v2201_v20 }
 0x457   :  { %v440_v59 = vsel %vm235_vm3, %v434_v56, -inf }
 0x458   :  { %441 = vmax.xlane.f32.xlu0 %v440_v59  ;;  %v437_v60 = vsel %vm235_vm3, %v429_v58, -inf }
 0x459   :  { %438 = vmax.xlane.f32.xlu1 %v437_v60 }
 0x46a   :  { %1964 = vrot.lane.b32.xlu1 %v2178_v13, %s2056_s15 }
 0x46e   :  { %1969 = vrot.lane.b32.xlu0 %v2178_v13, %s2057_s16  ;;  %709 = vrot.lane.b32.xlu1 %v2172_v12, %s2058_s17 }
 0x472   :  { %993 = vrot.lane.b32.xlu0 %v2172_v12, %s2059_s18 }
 0x4e5   :  { %v442_v61 = vpop.xlane.xlu0 %441 }
 0x4e6   :  { %v444_v62 = vsub.f32 %v434_v56, %v442_v61  ;;  %v439_v63 = vpop.xlane.xlu1 %438 }
 0x4e7   :  { %v443_v0 = vsub.f32 %v429_v58, %v439_v63  ;;  %v909_v63 = vld [vmem:[%s2410_s4 + $0x10] sm:$0xff] }
 0x4e8   :  { %v447_v1 = vmul.f32 1.442695, %v444_v62 }
 0x4e9   :  { %v445_v2 = vmul.f32 1.442695, %v443_v0  ;;  %v1970_v3 = vpop.permute.xlu0 %1969 }
 0x4ea   :  { %1996 = vpow2.f32 %v447_v1  ;;  %v1965_v4 = vpop.permute.xlu1 %1964  ;;  %v1972_v6 = vunpack.i.h.bf16 %v1970_v3  ;;  %v1971_v8 = vunpack.i.l.bf16 %v1970_v3 }
 0x4eb   :  { %v1967_v9 = vunpack.i.h.bf16 %v1965_v4  ;;  %v1966_v11 = vunpack.i.l.bf16 %v1965_v4  ;;  %1998 = vpow2.f32 %v445_v2 }
 0x4ec   :  { %v1868_v15 = vpack.c.bf16 %v1972_v6, %v1971_v8 }
 0x4ed   :  { %v1864_v14 = vpack.c.bf16 %v1967_v9, %v1966_v11 }
 0x4ee   :  { %v710_v22 = vpop.permute.xlu1 %709 }
 0x4ef   :  { %1865 = vmatprep.subr.bf16.mxu1 %v1864_v14 }
 0x4f0   :  { %1867 = vmatpush3.bf16.msra.mxu1 %v1864_v14 }
 0x4f1   :  { %1870 = vmatprep.subr.msk.bf16.mxu1 %vm2183_vm2, %v1868_v15 }
 0x4f4   :  { %v1997_v12 = vpop.eup %1996 }
 0x4f5   :  { %v452_v16 = vsel %vm235_vm3, %v1997_v12, 0.0  ;;  %v1999_v18 = vpop.eup %1998 }
 0x4f6   :  { %453 = vadd.xlane.f32.xlu1 %v452_v16  ;;  %v449_v21 = vsel %vm235_vm3, %v1999_v18, 0.0 }
 0x4fa   :  { %450 = vadd.xlane.f32.xlu1 %v449_v21 }
 0x50b   :  { %711 = vrot.lane.b32.xlu1 %v2170_v10, %s2058_s17 }
 0x50f   :  { %1974 = vrot.lane.b32.xlu1 %v2178_v13, %s2060_s19 }
 0x513   :  { %995 = vrot.lane.b32.xlu1 %v2170_v10, %s2059_s18  ;;  %v994_v10 = vpop.permute.xlu0 %993 }
 0x583   :  { %v454_v23 = vpop.xlane.xlu1 %453 }
 0x584   :  { %2000 = vrcp.f32 %v454_v23 }
 0x587   :  { %v451_v24 = vpop.xlane.xlu1 %450 }
 0x588   :  { %2002 = vrcp.f32 %v451_v24 }
 0x58b   :  { %v712_v25 = vpop.permute.xlu1 %711 }
 0x58e   :  { %v2001_v27 = vpop.eup %2000 }
 0x58f   :  { %v1975_v26 = vpop.permute.xlu1 %1974  ;;  %v458_v32 = vmul.f32 %v2001_v27, %v1997_v12 }
 0x590   :  { %v1977_v29 = vunpack.i.h.bf16 %v1975_v26  ;;  %v1976_v30 = vunpack.i.l.bf16 %v1975_v26 }
 0x592   :  { %v2003_v28 = vpop.eup %2002  ;;  %v1878_v33 = vpack.c.bf16 %v1977_v29, %v1976_v30 }
 0x593   :  { %v456_v31 = vmul.f32 %v2003_v28, %v1999_v18  ;;  %v996_v34 = vpop.permute.xlu1 %995 }
 0x595   :  { %1743 = vmatprep.mubr.msk.f32.mxu1 %vm235_vm3, %v456_v31 }
 0x596   :  { %1744 = vmatmul.mubr.msk.f32.vlgmr.msra.gmra.mrb[8].mxu1 %vm235_vm3, %v458_v32  ;;  %v1193_v32 = vld [vmem:[%s2410_s4 + $0x18] sm:$0xff] }
 0x597   :  { %1873 = vmatpush3.bf16.xpose.msk.msra.mxu1 %vm2183_vm2, %v1868_v15  ;;  %1760 = vmatprep.mubr.msk.f32.mxu1 %vm151_vm1, %v710_v22 }
 0x598   :  { %1880 = vmatprep.subr.msk.bf16.mxu1 %vm2183_vm2, %v1878_v33 }
 0x59e   :  { %1761 = vmatmul.mubr.msk.f32.vlgmr.msra.gmra.mrb[10].mxu1 %vm151_vm1, %v712_v25 }
 0x59f   :  { %1883 = vmatpush3.bf16.xpose.msk.msra.mxu1 %vm2183_vm2, %v1878_v33  ;;  %1779 = vmatprep.mubr.msk.f32.mxu1 %vm151_vm1, %v994_v10 }
 0x5a6   :  { %1780 = vmatmul.mubr.msk.f32.vlgmr.msra.gmra.mrb[12].mxu1 %vm151_vm1, %v996_v34 }
 0x669   :  { %v1745_v37 = vpop.f32.mrb[8].mxu1 }
 0x66a   :  { %v537_v38 = vpop.f32.mrb[9].mxu1 }
 0x66b   :  { %1748 = vmatprep.mubr.msk.f32.mxu0 %vm151_vm1, %v537_v38 }
 0x66c   :  { %1749 = vmatmul.mubr.msk.f32.vlgmr.msra.gmra.mrb[0].mxu0 %vm151_vm1, %v1745_v37 }
 0x66d   :  { %1753 = vmatprep.mubr.msk.f32.mxu0 %vm151_vm1, %v2223_v54  ;;  %1752 = vmatpush3.msra.mxu0 %v345_v36 }
 0x671   :  { %v1762_v17 = vpop.f32.mrb[10].mxu1 }
 0x672   :  { %v797_v39 = vadd.f32 %v1762_v17, %v2196_v19  ;;  %v791_v40 = vpop.f32.mrb[11].mxu1 }
 0x673   :  { %v792_v41 = vadd.f32 %v791_v40, %v2201_v20 }
 0x674   :  { %v803_v42 = vsel %vm235_vm3, %v797_v39, -inf  ;;  %1754 = vmatmul.mubr.msk.f32.vlgmr.msra.gmra.mrb[0].mxu0 %vm151_vm1, %v2221_v53 }
 0x675   :  { %804 = vmax.xlane.f32.xlu1 %v803_v42  ;;  %v800_v43 = vsel %vm235_vm3, %v792_v41, -inf }
 0x676   :  { %801 = vmax.xlane.f32.xlu0 %v800_v43 }
 0x679   :  { %v1781_v44 = vpop.f32.mrb[12].mxu1 }
 0x67a   :  { %v1075_v45 = vpop.f32.mrb[13].mxu1  ;;  %v1081_v60 = vadd.f32 %v1781_v44, %v2196_v19 }
 0x67c   :  { %v1087_v62 = vsel %vm235_vm3, %v1081_v60, -inf }
 0x686   :  { %1979 = vrot.lane.b32.xlu1 %v2178_v13, %s2061_s24 }
 0x68a   :  { %1984 = vrot.lane.b32.xlu1 %v2178_v13, %s2062_s2  ;;  %v1076_v13 = vadd.f32 %v1075_v45, %v2201_v20 }
 0x68c   :  { %v1084_v61 = vsel %vm235_vm3, %v1076_v13, -inf }
 0x702   :  { %v805_v46 = vpop.xlane.xlu1 %804 }
 0x703   :  { %v807_v47 = vsub.f32 %v797_v39, %v805_v46  ;;  %v802_v48 = vpop.xlane.xlu0 %801 }
 0x704   :  { %v806_v49 = vsub.f32 %v792_v41, %v802_v48 }
 0x705   :  { %v810_v50 = vmul.f32 1.442695, %v807_v47 }
 0x706   :  { %v808_v51 = vmul.f32 1.442695, %v806_v49  ;;  %v1980_v52 = vpop.permute.xlu1 %1979 }
 0x707   :  { %v1982_v53 = vunpack.i.h.bf16 %v1980_v52  ;;  %v1981_v54 = vunpack.i.l.bf16 %v1980_v52  ;;  %v1334_v52 = vld [vmem:[%s2414_s8 + $0x8] sm:$0xff] }
 0x708   :  { %2004 = vpow2.f32 %v808_v51  ;;  %v1333_v51 = vld [vmem:[%s2414_s8] sm:$0xff] }
 0x709   :  { %v1874_v55 = vpack.c.bf16 %v1982_v53, %v1981_v54  ;;  %2006 = vpow2.f32 %v810_v50  ;;  %v1888_v53 = vpack.c.bf16 %v1334_v52, %v1333_v51  ;;  %v1335_v54 = vld [vmem:[%s2414_s8 + $0x10] sm:$0xff] }
 0x70a   :  { %v1985_v4 = vpop.permute.xlu1 %1984 }
 0x70b   :  { %1875 = vmatprep.subr.bf16.mxu0 %v1874_v55  ;;  %v1987_v11 = vunpack.i.h.bf16 %v1985_v4  ;;  %v1986_v14 = vunpack.i.l.bf16 %v1985_v4  ;;  %1889 = vmatprep.subr.bf16.mxu1 %v1888_v53  ;;  %v1436_v4 = vld [vmem:[%s2416_s10 + $0x48] sm:$0xff] }
 0x70c   :  { %1877 = vmatpush3.bf16.msra.mxu0 %v1874_v55  ;;  %1891 = vmatpush3.bf16.msra.mxu1 %v1888_v53  ;;  %v1336_v55 = vld [vmem:[%s2414_s8 + $0x18] sm:$0xff] }
 0x70d   :  { %1770 = vmatprep.subr.mxu0 %v909_v63  ;;  %v1884_v18 = vpack.c.bf16 %v1987_v11, %v1986_v14  ;;  %v1439_v11 = vld [vmem:[%s2416_s10 + $0x60] sm:$0xff]  ;;  %v1440_v14 = vld [vmem:[%s2416_s10 + $0x68] sm:$0xff] }
 0x712   :  { %v2005_v56 = vpop.eup %2004 }
 0x713   :  { %v812_v57 = vsel %vm235_vm3, %v2005_v56, 0.0  ;;  %v2007_v58 = vpop.eup %2006 }
 0x714   :  { %813 = vadd.xlane.f32.xlu0 %v812_v57  ;;  %v815_v59 = vsel %vm235_vm3, %v2007_v58, 0.0  ;;  %v1427_v57 = vld [vmem:[%s2416_s10] sm:$0xff] }
 0x718   :  { %816 = vadd.xlane.f32.xlu0 %v815_v59 }
 0x71c   :  { %1085 = vmax.xlane.f32.xlu0 %v1084_v61 }
 0x720   :  { %1088 = vmax.xlane.f32.xlu0 %v1087_v62  ;;  %v1431_v62 = vld [vmem:[%s2416_s10 + $0x20] sm:$0xff] }
 0x7a1   :  { %v814_v0 = vpop.xlane.xlu0 %813 }
 0x7a2   :  { %2008 = vrcp.f32 %v814_v0 }
 0x7a5   :  { %v817_v1 = vpop.xlane.xlu0 %816 }
 0x7a6   :  { %2010 = vrcp.f32 %v817_v1  ;;  %v1433_v1 = vld [vmem:[%s2416_s10 + $0x30] sm:$0xff] }
 0x7a9   :  { %v1086_v20 = vpop.xlane.xlu0 %1085 }
 0x7aa   :  { %v1090_v2 = vsub.f32 %v1076_v13, %v1086_v20  ;;  %v1429_v13 = vld [vmem:[%s2416_s10 + $0x10] sm:$0xff]  ;;  %v1434_v20 = vld [vmem:[%s2416_s10 + $0x38] sm:$0xff] }
 0x7ac   :  { %v2009_v3 = vpop.eup %2008  ;;  %v1092_v19 = vmul.f32 1.442695, %v1090_v2  ;;  %v1908_v2 = vpack.c.bf16 %v1434_v20, %v1433_v1  ;;  %v1631_v1 = vld [vmem:[%s2418_s12] ss:$0 sm:$0xff] }
 0x7ad   :  { %v1089_v6 = vpop.xlane.xlu0 %1088  ;;  %v819_v8 = vmul.f32 %v2009_v3, %v2005_v56  ;;  %v1892_v56 = vpack.c.bf16 %v1336_v55, %v1335_v54  ;;  %v1435_v3 = vld [vmem:[%s2416_s10 + $0x40] sm:$0xff] }
 0x7ae   :  { %2012 = vpow2.f32 %v1092_v19  ;;  %v1091_v9 = vsub.f32 %v1081_v60, %v1089_v6  ;;  %v1430_v60 = vld [vmem:[%s2416_s10 + $0x18] sm:$0xff]  ;;  %v1912_v19 = vpack.c.bf16 %v1436_v4, %v1435_v3  ;;  %v1437_v6 = vld [vmem:[%s2416_s10 + $0x50] sm:$0xff] }
 0x7af   :  { %1767 = vmatprep.mubr.msk.f32.mxu0 %vm235_vm3, %v819_v8  ;;  %1893 = vmatprep.subr.bf16.mxu1 %v1892_v56  ;;  %v1900_v61 = vpack.c.bf16 %v1430_v60, %v1429_v13  ;;  %v1438_v8 = vld [vmem:[%s2416_s10 + $0x58] sm:$0xff] }
 0x7b0   :  { %v2011_v15 = vpop.eup %2010  ;;  %v1094_v12 = vmul.f32 1.442695, %v1091_v9  ;;  %1895 = vmatpush3.bf16.msra.mxu1 %v1892_v56  ;;  %v1916_v9 = vpack.c.bf16 %v1438_v8, %v1437_v6 }
 0x7b1   :  { %v821_v16 = vmul.f32 %v2011_v15, %v2007_v58  ;;  %v1428_v58 = vld [vmem:[%s2416_s10 + $0x8] sm:$0xff]  ;;  %v1920_v15 = vpack.c.bf16 %v1440_v14, %v1439_v11 }
 0x7b2   :  { %2014 = vpow2.f32 %v1094_v12  ;;  %v1896_v59 = vpack.c.bf16 %v1428_v58, %v1427_v57 }
 0x7b3   :  { %1768 = vmatmul.mubr.msk.f32.vlgmr.msra.gmra.mrb[2].mxu0 %vm235_vm3, %v821_v16 }
 0x7b4   :  { %1771 = vmatpush3.msra.mxu0 %v909_v63  ;;  %v1432_v63 = vld [vmem:[%s2416_s10 + $0x28] sm:$0xff] }
 0x7b5   :  { %1885 = vmatprep.subr.bf16.mxu0 %v1884_v18  ;;  %v1904_v0 = vpack.c.bf16 %v1432_v63, %v1431_v62 }
 0x7b8   :  { %v2013_v21 = vpop.eup %2012 }
 0x7b9   :  { %v1096_v22 = vsel %vm235_vm3, %v2013_v21, 0.0 }
 0x7ba   :  { %1097 = vadd.xlane.f32.xlu0 %v1096_v22 }
 0x7bc   :  { %v2015_v23 = vpop.eup %2014 }
 0x7bd   :  { %v1099_v24 = vsel %vm235_vm3, %v2015_v23, 0.0 }
 0x7be   :  { %1100 = vadd.xlane.f32.xlu0 %v1099_v24 }
 0x847   :  { %v1098_v25 = vpop.xlane.xlu0 %1097 }
 0x848   :  { %2016 = vrcp.f32 %v1098_v25  ;;  %v1625_v25 = vld [vmem:[%s2412_s6] ss:$0 sm:$0xff] }
 0x84b   :  { %v1101_v26 = vpop.xlane.xlu0 %1100 }
 0x84c   :  { %2018 = vrcp.f32 %v1101_v26 }
 0x852   :  { %v2017_v27 = vpop.eup %2016 }
 0x853   :  { %v1103_v31 = vmul.f32 %v2017_v27, %v2013_v21  ;;  %v1626_v27 = vld [vmem:[%s2413_s7] ss:$0 sm:$0xff] }
 0x856   :  { %v2019_v30 = vpop.eup %2018 }
 0x857   :  { %v1105_v33 = vmul.f32 %v2019_v30, %v2015_v23 }
 0x886   :  { %v1769_v28 = vpop.f32.mrb[2].mxu0 }
 0x887   :  { %v900_v29 = vpop.f32.mrb[3].mxu0 }
 0x888   :  { %1772 = vmatprep.mubr.msk.f32.mxu0 %vm151_vm1, %v900_v29 }
 0x889   :  { %1773 = vmatmul.mubr.msk.f32.vlgmr.msra.gmra.mrb[0].mxu0 %vm151_vm1, %v1769_v28 }
 0x88a   :  { %1887 = vmatpush3.bf16.msra.mxu0 %v1884_v18  ;;  %1786 = vmatprep.mubr.msk.f32.mxu0 %vm235_vm3, %v1103_v31 }
 0x88b   :  { %1789 = vmatprep.subr.mxu0 %v1193_v32 }
 0x88d   :  { %1787 = vmatmul.mubr.msk.f32.vlgmr.msra.gmra.mrb[4].mxu0 %vm235_vm3, %v1105_v33 }
 0x88e   :  { %1790 = vmatpush3.msra.mxu0 %v1193_v32 }
 0x88f   :  { %1897 = vmatprep.subr.bf16.mxu0 %v1896_v59 }
 0x960   :  { %v1788_v10 = vpop.f32.mrb[4].mxu0 }
 0x961   :  { %v1184_v34 = vpop.f32.mrb[5].mxu0 }
 0x962   :  { %1791 = vmatprep.mubr.msk.f32.mxu0 %vm151_vm1, %v1184_v34  ;;  %v1442_v34 = vld [vmem:[%s2416_s10 + $0x78] sm:$0xff] }
 0x963   :  { %1792 = vmatmul.mubr.msk.f32.vlgmr.msra.gmra.mrb[0].mxu0 %vm151_vm1, %v1788_v10  ;;  %v1441_v10 = vld [vmem:[%s2416_s10 + $0x70] sm:$0xff] }
 0x964   :  { %1899 = vmatpush3.bf16.msra.mxu0 %v1896_v59 }
 0x965   :  { %1901 = vmatprep.subr.bf16.mxu0 %v1900_v61 }
 0x968   :  { %1903 = vmatpush3.bf16.msra.mxu0 %v1900_v61 }
 0x969   :  { %1905 = vmatprep.subr.bf16.mxu0 %v1904_v0 }
 0x96c   :  { %1907 = vmatpush3.bf16.msra.mxu0 %v1904_v0 }
 0x96d   :  { %1909 = vmatprep.subr.bf16.mxu0 %v1908_v2 }
 0x970   :  { %1911 = vmatpush3.bf16.msra.mxu0 %v1908_v2  ;;  %v1632_v2 = vld [vmem:[%s2419_s13] ss:$0 sm:$0xff] }
 0x971   :  { %1913 = vmatprep.subr.bf16.mxu0 %v1912_v19 }
 0x974   :  { %1915 = vmatpush3.bf16.msra.mxu0 %v1912_v19 }
 0x975   :  { %1917 = vmatprep.subr.bf16.mxu0 %v1916_v9 }
 0x978   :  { %1919 = vmatpush3.bf16.msra.mxu0 %v1916_v9 }
 0x979   :  { %1921 = vmatprep.subr.bf16.mxu0 %v1920_v15 }
 0x97c   :  { %1923 = vmatpush3.bf16.msra.mxu0 %v1920_v15 }
 0xa36   :  { %v1793_v36 = vpop.f32.mrb[0].mxu0 }
 0xa37   :  { %v1285_v37 = vadd.f32 %v1793_v36, %v1624_v35  ;;  %v1266_v38 = vpop.f32.mrb[1].mxu0  ;;  %v1627_v36 = vld [vmem:[%s2415_s9] ss:$0 sm:$0xff] }
 0xa38   :  { %v1284_v17 = vadd.f32 %v1624_v35, %v1266_v38  ;;  %v1924_v35 = vpack.c.bf16 %v1442_v34, %v1441_v10 }
 0xa39   :  { %v1287_v39 = vadd.f32 %v1285_v37, %v2163_v7 }
 0xa3a   :  { %v1286_v40 = vadd.f32 %v1284_v17, %v2156_v5  ;;  %1925 = vmatprep.subr.bf16.mxu0 %v1924_v35 }
 0xa3b   :  { %v1293_v41 = vsel %vm61_vm0, %v1287_v39, 0.0  ;;  %1927 = vmatpush3.bf16.msra.mxu0 %v1924_v35 }
 0xa3c   :  { %1294 = vadd.xlane.f32.xlu1 %v1293_v41  ;;  %v1290_v42 = vsel %vm61_vm0, %v1286_v40, 0.0 }
 0xa3d   :  { %1291 = vadd.xlane.f32.xlu0 %v1290_v42  ;;  %v1630_v42 = vld [vmem:[%s2417_s11] ss:$0 sm:$0xff] }
 0xac9   :  { %v1295_v43 = vpop.xlane.xlu1 %1294 }
 0xaca   :  { %v1298_v44 = vmul.f32 0.03125, %v1295_v43  ;;  %v1292_v45 = vpop.xlane.xlu0 %1291 }
 0xacb   :  { %v1297_v46 = vmul.f32 0.03125, %v1292_v45 }
 0xacc   :  { %v2301_v47 = vsub.f32 %v1287_v39, %v1298_v44 }
 0xacd   :  { %v1299_v48 = vsub.f32 %v1286_v40, %v1297_v46 }
 0xace   :  { %v1302_v7 = vmul.f32 %v2301_v47, %v2301_v47 }
 0xacf   :  { %v1301_v49 = vmul.f32 %v1299_v48, %v1299_v48 }
 0xad0   :  { %v1306_v5 = vsel %vm61_vm0, %v1302_v7, 0.0 }
 0xad1   :  { %v1303_v50 = vsel %vm61_vm0, %v1301_v49, 0.0 }
 0xad2   :  { %1304 = vadd.xlane.f32.xlu0 %v1303_v50 }
 0xad6   :  { %1307 = vadd.xlane.f32.xlu0 %v1306_v5 }
 0xb5f   :  { %v1305_v12 = vpop.xlane.xlu0 %1304 }
 0xb60   :  { %v1309_v16 = vmul.f32 0.03125, %v1305_v12 }
 0xb62   :  { %v1311_v18 = vadd.f32 1e-05, %v1309_v16 }
 0xb63   :  { %v1308_v21 = vpop.xlane.xlu0 %1307 }
 0xb64   :  { %2020 = vrsqrt.f32 %v1311_v18  ;;  %v1310_v22 = vmul.f32 0.03125, %v1308_v21 }
 0xb66   :  { %v1312_v23 = vadd.f32 1e-05, %v1310_v22 }
 0xb68   :  { %2022 = vrsqrt.f32 %v1312_v23 }
 0xb6e   :  { %v2021_v24 = vpop.eup %2020 }
 0xb6f   :  { %v1315_v26 = vmul.f32 %v2021_v24, %v1299_v48 }
 0xb71   :  { %v1323_v28 = vmul.f32 %v1625_v25, %v1315_v26 }
 0xb72   :  { %v2023_v29 = vpop.eup %2022 }
 0xb73   :  { %v1316_v30 = vmul.f32 %v2023_v29, %v2301_v47  ;;  %v1331_v31 = vadd.f32 %v1626_v27, %v1323_v28 }
 0xb75   :  { %v1324_v32 = vmul.f32 %v1625_v25, %v1316_v30  ;;  %1802 = vmatprep.mubr.msk.f32.mxu1 %vm61_vm0, %v1331_v31 }
 0xb77   :  { %v1332_v33 = vadd.f32 %v1626_v27, %v1324_v32 }
 0xb79   :  { %1803 = vmatmul.mubr.msk.f32.vlgmr.msra.gmra.mrb[14].mxu1 %vm61_vm0, %v1332_v33 }
 0xc4c   :  { %v1804_v37 = vpop.f32.mrb[14].mxu1 }
 0xc4d   :  { %v1422_v38 = vadd.f32 %v1804_v37, %v1627_v36  ;;  %v1416_v17 = vpop.f32.mrb[15].mxu1 }
 0xc4e   :  { %v1417_v39 = vadd.f32 %v1627_v36, %v1416_v17 }
 0xc4f   :  { %v1426_v41 = vmax.f32 %v1422_v38, 0.0 }
 0xc50   :  { %v1425_v40 = vmax.f32 %v1417_v39, 0.0 }
 0xc52   :  { %1837 = vmatprep.mubr.f32.mxu0 %v1425_v40 }
 0xc53   :  { %1838 = vmatmul.mubr.f32.vlgmr.msra.gmra.mrb[6].mxu0 %v1426_v41 }
 0xd26   :  { %v1839_v43 = vpop.f32.mrb[6].mxu0 }
 0xd27   :  { %v1516_v44 = vpop.f32.mrb[7].mxu0  ;;  %v1522_v45 = vadd.f32 %v1839_v43, %v1630_v42 }
 0xd28   :  { %v1517_v46 = vadd.f32 %v1630_v42, %v1516_v44 }
 0xd29   :  { %v1526_v49 = vadd.f32 %v1522_v45, %v1332_v33 }
 0xd2a   :  { %v1525_v47 = vadd.f32 %v1517_v46, %v1331_v31 }
 0xd2b   :  { %v1532_v50 = vsel %vm61_vm0, %v1526_v49, 0.0 }
 0xd2c   :  { %v1529_v48 = vsel %vm61_vm0, %v1525_v47, 0.0 }
 0xd2d   :  { %1530 = vadd.xlane.f32.xlu0 %v1529_v48 }
 0xd31   :  { %1533 = vadd.xlane.f32.xlu0 %v1532_v50 }
 0xdba   :  { %v1531_v7 = vpop.xlane.xlu0 %1530 }
 0xdbb   :  { %v1535_v5 = vmul.f32 0.03125, %v1531_v7 }
 0xdbd   :  { %v1537_v51 = vsub.f32 %v1525_v47, %v1535_v5 }
 0xdbe   :  { %v1534_v52 = vpop.xlane.xlu0 %1533 }
 0xdbf   :  { %v1536_v53 = vmul.f32 0.03125, %v1534_v52  ;;  %v1539_v54 = vmul.f32 %v1537_v51, %v1537_v51 }
 0xdc1   :  { %v1538_v55 = vsub.f32 %v1526_v49, %v1536_v53  ;;  %v1541_v56 = vsel %vm61_vm0, %v1539_v54, 0.0 }
 0xdc2   :  { %1542 = vadd.xlane.f32.xlu0 %v1541_v56 }
 0xdc3   :  { %v1540_v57 = vmul.f32 %v1538_v55, %v1538_v55 }
 0xdc5   :  { %v1544_v58 = vsel %vm61_vm0, %v1540_v57, 0.0 }
 0xdc6   :  { %1545 = vadd.xlane.f32.xlu0 %v1544_v58 }
 0xe4f   :  { %v1543_v13 = vpop.xlane.xlu0 %1542 }
 0xe50   :  { %v1547_v59 = vmul.f32 0.03125, %v1543_v13 }
 0xe52   :  { %v1549_v60 = vadd.f32 1e-05, %v1547_v59 }
 0xe53   :  { %v1546_v61 = vpop.xlane.xlu0 %1545 }
 0xe54   :  { %2024 = vrsqrt.f32 %v1549_v60  ;;  %v1548_v62 = vmul.f32 0.03125, %v1546_v61 }
 0xe56   :  { %v1550_v63 = vadd.f32 1e-05, %v1548_v62 }
 0xe58   :  { %2026 = vrsqrt.f32 %v1550_v63 }
 0xe5e   :  { %v2025_v0 = vpop.eup %2024 }
 0xe5f   :  { %v1553_v20 = vmul.f32 %v2025_v0, %v1537_v51 }
 0xe61   :  { %v1561_v3 = vmul.f32 %v1631_v1, %v1553_v20 }
 0xe62   :  { %v2027_v4 = vpop.eup %2026 }
 0xe63   :  { %v1554_v19 = vmul.f32 %v2027_v4, %v1538_v55  ;;  %v1569_v6 = vadd.f32 %v1632_v2, %v1561_v3 }
 0xe65   :  { %v1562_v8 = vmul.f32 %v1631_v1, %v1554_v19  ;;  %1571 = vst.msk [vmem:[#allocation2] sm:$0xff] %vm61_vm0, %v1569_v6 }
 0xe67   :  { %v1570_v9 = vadd.f32 %v1632_v2, %v1562_v8 }
 0xe69   :  { %1572 = vst.msk [vmem:[#allocation2 + $0x8] sm:$0xff] %vm61_vm0, %v1570_v9 }
 0xe6a   :  { %2039 = shalt.err (!%p2036_p4)
}
 0xe6b   :  { %s2040_s1 = scalar_lea.hbm %s2420_s14, 256 }
 0xe6c   :  { %p2041_p5 = scmp.ne.s32.totalorder %s2420_s14, %s2040_s1  ;;  %p2044_p6 = scmp.lt.u32.totalorder %s2040_s1, %s2420_s14 }
 0xe6e   :  { %p2046_p7 = pnand %p2044_p6, %p2041_p5 }
 0xe70   :  { %2049 = shalt.err (!%p2046_p7)
}
 0xe71   :  { %s2064_s19 = smov 128   ;;  %s2065_s20 = smov 8  }
 0xe72   :  { %1584 = dma.vmem_to_hbm [thread:$0]  %s1579_s29, 256, %s2420_s14, [#allocation3], %s2064_s19, %s2064_s19, %s2065_s20  }
 0xe73   :  { %2050 = dma.done.wait [#allocation3], 256  }
 0xe74   :  { %2051 = vsyncadd [#allocation3], 4294967040 }
 0xe75   :  { %1588 = vsyncpa [#allocation3], 1 }

</bundles_post_ra>
